<compile_context>
chip_gen: v6e
topology: v6e:2x2x1
jax: 0.10.0
libtpu: 0.0.40
codegen_flags: <defaults>
</compile_context>

<pallas_src>
import functools

import jax
import jax.numpy as jnp
from jax.experimental import pallas as pl
from jax.experimental.pallas import tpu as pltpu

NEG_SLOPE = 0.2
NEG_INF = -1e30
BIG = 1e30


def _gat_layer(h, adj, mask_add, w_ext, b, fout):
    """One single-head GATConv on dense adjacency. Pure jnp; runs inside the kernel.

    w_ext = [W | W @ attn_l.T | W @ attn_r.T]  (Fin, Fout+2): one MXU pass produces
    z and both attention scores.
    """
    z_ext = jnp.dot(h, w_ext, preferred_element_type=jnp.float32)    # (N, Fout+2)
    z = z_ext[:, :fout]                                              # (N, Fout)
    el = z_ext[:, fout:fout + 1]                                     # (N, 1) src scores
    er = z_ext[:, fout + 1:fout + 2]                                 # (N, 1) dst scores
    e = er + jnp.transpose(el)                                       # (N, N)
    e = jnp.maximum(e, NEG_SLOPE * e)                                # leaky_relu(0.2)
    masked = e + mask_add                                            # additive edge mask
    rowmax = jnp.max(masked, axis=-1, keepdims=True)
    # * adj: exact zeros on non-edges AND keeps zero-in-degree rows all-zero.
    p = jnp.exp(masked - rowmax) * adj
    denom = jnp.sum(p, axis=-1, keepdims=True)
    inv = pl.reciprocal(jnp.where(denom == 0.0, 1.0, denom))         # exact recip, EUP path
    alpha = p * inv
    return jnp.dot(alpha, z, preferred_element_type=jnp.float32) + b


def actor_kernel(x_ref, c_ref, out_ref, *, n, in_dim, hidden_dim, out_dim):
    # Static unpack of the packed constant slab (zero-cost static slices).
    r_w1 = 0
    r_b1 = in_dim
    r_w2 = in_dim + 1
    r_b2 = in_dim + 1 + hidden_dim
    r_adj = in_dim + 2 + hidden_dim
    r_msk = r_adj + n

    w1e = c_ref[r_w1:r_w1 + in_dim, :hidden_dim + 2]
    b1 = c_ref[r_b1:r_b1 + 1, :hidden_dim]
    w2e = c_ref[r_w2:r_w2 + hidden_dim, :out_dim + 2]
    b2 = c_ref[r_b2:r_b2 + 1, :out_dim]
    adj = c_ref[r_adj:r_adj + n, :n]
    mask_add = c_ref[r_msk:r_msk + n, :n]

    x = x_ref[...]
    h1 = _gat_layer(x, adj, mask_add, w1e, b1, hidden_dim)
    h2 = _gat_layer(h1, adj, mask_add, w2e, b2, out_dim)

    # Final torch.softmax(x, dim=-1) on the (N, OUT) logits, stored directly.
    m = jnp.max(h2, axis=-1, keepdims=True)
    p = jnp.exp(h2 - m)
    out_ref[...] = p * pl.reciprocal(jnp.sum(p, axis=-1, keepdims=True))


def prepare_actor(params, adj):
    """One-time host-side preparation (hoisted out of the per-call hot path).

    Folds the attention vectors into the fc weights, precomputes the additive edge
    mask, and packs every constant operand into a single f32 slab (one DMA).
    """
    in_dim, hidden_dim = params["w1"].shape
    out_dim = params["w2"].shape[1]
    n = adj.shape[0]

    w1e = jnp.concatenate(
        [params["w1"], params["w1"] @ params["al1"].T, params["w1"] @ params["ar1"].T], axis=1)
    w2e = jnp.concatenate(
        [params["w2"], params["w2"] @ params["al2"].T, params["w2"] @ params["ar2"].T], axis=1)
    mask_add = (adj - 1.0) * BIG                      # 0 on edges, -1e30 off edges

    cols = max(hidden_dim + 2, out_dim + 2, n)
    rows = in_dim + 1 + hidden_dim + 1 + 2 * n
    c = jnp.zeros((rows, cols), jnp.float32)
    r = 0
    c = c.at[r:r + in_dim, :hidden_dim + 2].set(w1e); r += in_dim
    c = c.at[r:r + 1, :hidden_dim].set(params["b1"]); r += 1
    c = c.at[r:r + hidden_dim, :out_dim + 2].set(w2e); r += hidden_dim
    c = c.at[r:r + 1, :out_dim].set(params["b2"]); r += 1
    c = c.at[r:r + n, :n].set(adj); r += n
    c = c.at[r:r + n, :n].set(mask_add); r += n

    return {"const": c, "n": n, "in_dim": in_dim,
            "hidden_dim": hidden_dim, "out_dim": out_dim}


def actor_forward(x, prepared):
    """x: (N, IN) single state, or (B, N, IN) batched states (dgl.batch path)."""
    n = prepared["n"]
    in_dim = prepared["in_dim"]
    hidden_dim = prepared["hidden_dim"]
    out_dim = prepared["out_dim"]
    const = prepared["const"]

    kernel = functools.partial(actor_kernel, n=n, in_dim=in_dim,
                               hidden_dim=hidden_dim, out_dim=out_dim)

    flops_per = int(
        2 * n * in_dim * (hidden_dim + 2)        # layer-1 fused projection
        + 2 * n * n * hidden_dim                 # layer-1 aggregation
        + 2 * n * hidden_dim * (out_dim + 2)     # layer-2 fused projection
        + 2 * n * n * out_dim                    # layer-2 aggregation
        + 12 * n * n)                            # elementwise attention work
    trans_per = int(2 * n * n + n * out_dim)

    if x.ndim == 2:
        # Single state: gridless, whole-array VMEM operands, no trailing slice.
        vmem = pl.BlockSpec(memory_space=pltpu.MemorySpace.VMEM)
        return pl.pallas_call(
            kernel,
            out_shape=jax.ShapeDtypeStruct((n, out_dim), jnp.float32),
            in_specs=[vmem, vmem],
            out_specs=vmem,
            cost_estimate=pl.CostEstimate(
                flops=flops_per, transcendentals=trans_per,
                bytes_accessed=int(4 * (x.size + const.size + n * out_dim))),
        )(x, const)

    # Batched states: one grid step per state, parallel across TensorCores (v7x).
    batch = x.shape[0]
    return pl.pallas_call(
        kernel,
        out_shape=jax.ShapeDtypeStruct((batch, n, out_dim), jnp.float32),
        grid=(batch,),
        in_specs=[pl.BlockSpec((None, n, in_dim), lambda b: (b, 0, 0)),
                  pl.BlockSpec(const.shape, lambda b: (0, 0))],
        out_specs=pl.BlockSpec((None, n, out_dim), lambda b: (b, 0, 0)),
        compiler_params=pltpu.CompilerParams(dimension_semantics=("parallel",)),
        cost_estimate=pl.CostEstimate(
            flops=batch * flops_per, transcendentals=batch * trans_per,
            bytes_accessed=int(4 * (x.size + const.size + batch * n * out_dim))),
    )(x, const)


def _reference(x, adj, params):
    """Unfused pure-jnp reference (original DGL-style formulation)."""
    def layer(h, w, al, ar, b):
        z = h @ w
        el = jnp.sum(z * al, axis=-1, keepdims=True)
        er = jnp.sum(z * ar, axis=-1, keepdims=True)
        e = er + jnp.transpose(el)
        e = jnp.where(e > 0, e, NEG_SLOPE * e)
        masked = jnp.where(adj > 0, e, NEG_INF)
        rowmax = jnp.max(masked, axis=-1, keepdims=True)
        p = jnp.where(adj > 0, jnp.exp(masked - rowmax), 0.0)
        denom = jnp.sum(p, axis=-1, keepdims=True)
        alpha = p / jnp.where(denom == 0.0, 1.0, denom)
        return alpha @ z + b

    h1 = layer(x, params["w1"], params["al1"], params["ar1"], params["b1"])
    h2 = layer(h1, params["w2"], params["al2"], params["ar2"], params["b2"])
    return jax.nn.softmax(h2, axis=-1)


def init_params(key, in_dim, hidden_dim, out_dim):
    ks = jax.random.split(key, 8)
    s = 0.1
    return {
        "w1": s * jax.random.normal(ks[0], (in_dim, hidden_dim), jnp.float32),
        "al1": s * jax.random.normal(ks[1], (1, hidden_dim), jnp.float32),
        "ar1": s * jax.random.normal(ks[2], (1, hidden_dim), jnp.float32),
        "b1": jnp.zeros((1, hidden_dim), jnp.float32),
        "w2": s * jax.random.normal(ks[3], (hidden_dim, out_dim), jnp.float32),
        "al2": s * jax.random.normal(ks[4], (1, out_dim), jnp.float32),
        "ar2": s * jax.random.normal(ks[5], (1, out_dim), jnp.float32),
        "b2": jnp.zeros((1, out_dim), jnp.float32),
    }


if __name__ == "__main__":
    N, IN_DIM, HIDDEN, OUT_DIM, BATCH = 8, 8, 32, 8, 4

    key = jax.random.PRNGKey(0)
    k_x, k_xb, k_adj, k_p = jax.random.split(key, 4)

    x_single = jax.random.normal(k_x, (N, IN_DIM), jnp.float32)
    x_batch = jax.random.normal(k_xb, (BATCH, N, IN_DIM), jnp.float32)
    # deterministic sparse directed graph; adj[v, u] = 1 iff edge u -> v
    adj = (jax.random.uniform(k_adj, (N, N)) < 0.4).astype(jnp.float32)
    params = init_params(k_p, IN_DIM, HIDDEN, OUT_DIM)

    # One-time preparation (weight folding + constant packing), reused across calls.
    prepared = prepare_actor(params, adj)

    out1 = jax.block_until_ready(actor_forward(x_single, prepared))     # (N, OUT)
    outb = jax.block_until_ready(actor_forward(x_batch, prepared))      # (B, N, OUT)

    ref1 = _reference(x_single, adj, params)
    refb = jax.vmap(lambda xx: _reference(xx, adj, params))(x_batch)

    assert out1.shape == (N, OUT_DIM)
    assert outb.shape == (BATCH, N, OUT_DIM)
    assert bool(jnp.allclose(out1, ref1, atol=1e-5, rtol=1e-5)), "single-state mismatch"
    assert bool(jnp.allclose(outb, refb, atol=1e-5, rtol=1e-5)), "batched mismatch"

    print("KERNEL_OK")
</pallas_src>

<mosaic_0001>
module attributes {stable_mosaic.version = 11 : i64} {
  func.func @actor_kernel(%arg0: memref<8x8xf32, #tpu.memory_space<vmem>>, %arg1: memref<58x34xf32, #tpu.memory_space<vmem>>, %arg2: memref<8x8xf32, #tpu.memory_space<vmem>>) attributes {dimension_semantics = [], scalar_prefetch = 0 : i64, scratch_operands = 0 : i64, tpu.core_type = #tpu.core_type<tc>} {
    %c0 = arith.constant 0 : index
    %c0_0 = arith.constant 0 : index
    %0 = vector.load %arg1[%c0, %c0_0] : memref<58x34xf32, #tpu.memory_space<vmem>>, vector<8x34xf32>
    %c8 = arith.constant 8 : index
    %c0_1 = arith.constant 0 : index
    %1 = vector.load %arg1[%c8, %c0_1] : memref<58x34xf32, #tpu.memory_space<vmem>>, vector<1x32xf32>
    %c9 = arith.constant 9 : index
    %c0_2 = arith.constant 0 : index
    %2 = vector.load %arg1[%c9, %c0_2] : memref<58x34xf32, #tpu.memory_space<vmem>>, vector<32x10xf32>
    %c41 = arith.constant 41 : index
    %c0_3 = arith.constant 0 : index
    %3 = vector.load %arg1[%c41, %c0_3] : memref<58x34xf32, #tpu.memory_space<vmem>>, vector<1x8xf32>
    %c42 = arith.constant 42 : index
    %c0_4 = arith.constant 0 : index
    %4 = vector.load %arg1[%c42, %c0_4] : memref<58x34xf32, #tpu.memory_space<vmem>>, vector<8x8xf32>
    %c50 = arith.constant 50 : index
    %c0_5 = arith.constant 0 : index
    %5 = vector.load %arg1[%c50, %c0_5] : memref<58x34xf32, #tpu.memory_space<vmem>>, vector<8x8xf32>
    %c0_6 = arith.constant 0 : index
    %c0_7 = arith.constant 0 : index
    %6 = vector.load %arg0[%c0_6, %c0_7] : memref<8x8xf32, #tpu.memory_space<vmem>>, vector<8x8xf32>
    %cst = arith.constant dense<0.000000e+00> : vector<8x34xf32>
    %7 = tpu.matmul %6, %0, %cst {dimension_numbers = #tpu.dot_dimension_numbers<[1], [0], [0], [1], [0, 0, 1, 1], [], []>} : vector<8x8xf32>, vector<8x34xf32>, vector<8x34xf32> -> vector<8x34xf32>
    %8 = vector.extract_strided_slice %7 {offsets = [0, 0], sizes = [8, 32], strides = [1, 1]} : vector<8x34xf32> to vector<8x32xf32>
    %9 = vector.extract_strided_slice %7 {offsets = [0, 32], sizes = [8, 1], strides = [1, 1]} : vector<8x34xf32> to vector<8x1xf32>
    %10 = vector.extract_strided_slice %7 {offsets = [0, 33], sizes = [8, 1], strides = [1, 1]} : vector<8x34xf32> to vector<8x1xf32>
    %11 = tpu.transpose %9, [1, 0] : vector<8x1xf32> -> vector<1x8xf32>
    %12 = vector.broadcast %10 : vector<8x1xf32> to vector<8x8xf32>
    %13 = vector.broadcast %11 : vector<1x8xf32> to vector<8x8xf32>
    %14 = arith.addf %12, %13 : vector<8x8xf32>
    %cst_8 = arith.constant 2.000000e-01 : f32
    %15 = vector.broadcast %cst_8 : f32 to vector<8x8xf32>
    %16 = arith.mulf %15, %14 : vector<8x8xf32>
    %17 = arith.maximumf %14, %16 : vector<8x8xf32>
    %18 = arith.addf %17, %5 : vector<8x8xf32>
    %cst_9 = arith.constant dense<0xFF800000> : vector<8xf32>
    %19 = vector.multi_reduction <maximumf>, %18, %cst_9 [1] : vector<8x8xf32> to vector<8xf32>
    %20 = vector.shape_cast %19 : vector<8xf32> to vector<8x1xf32>
    %21 = vector.broadcast %20 : vector<8x1xf32> to vector<8x8xf32>
    %22 = arith.subf %18, %21 : vector<8x8xf32>
    %23 = math.exp %22 : vector<8x8xf32>
    %24 = arith.mulf %23, %4 : vector<8x8xf32>
    %cst_10 = arith.constant dense<0.000000e+00> : vector<8xf32>
    %25 = vector.multi_reduction <add>, %24, %cst_10 [1] : vector<8x8xf32> to vector<8xf32>
    %26 = vector.shape_cast %25 : vector<8xf32> to vector<8x1xf32>
    %cst_11 = arith.constant 0.000000e+00 : f32
    %27 = vector.broadcast %cst_11 : f32 to vector<8x1xf32>
    %28 = arith.cmpf oeq, %26, %27 : vector<8x1xf32>
    %cst_12 = arith.constant 1.000000e+00 : f32
    %29 = vector.broadcast %cst_12 : f32 to vector<8x1xf32>
    %30 = arith.select %28, %29, %26 : vector<8x1xi1>, vector<8x1xf32>
    %31 = tpu.reciprocal %30 : vector<8x1xf32> -> vector<8x1xf32>
    %32 = vector.broadcast %31 : vector<8x1xf32> to vector<8x8xf32>
    %33 = arith.mulf %24, %32 : vector<8x8xf32>
    %cst_13 = arith.constant dense<0.000000e+00> : vector<8x32xf32>
    %34 = tpu.matmul %33, %8, %cst_13 {dimension_numbers = #tpu.dot_dimension_numbers<[1], [0], [0], [1], [0, 0, 1, 1], [], []>} : vector<8x8xf32>, vector<8x32xf32>, vector<8x32xf32> -> vector<8x32xf32>
    %35 = vector.broadcast %1 : vector<1x32xf32> to vector<8x32xf32>
    %36 = arith.addf %34, %35 : vector<8x32xf32>
    %cst_14 = arith.constant dense<0.000000e+00> : vector<8x10xf32>
    %37 = tpu.matmul %36, %2, %cst_14 {dimension_numbers = #tpu.dot_dimension_numbers<[1], [0], [0], [1], [0, 0, 1, 1], [], []>} : vector<8x32xf32>, vector<32x10xf32>, vector<8x10xf32> -> vector<8x10xf32>
    %38 = vector.extract_strided_slice %37 {offsets = [0, 0], sizes = [8, 8], strides = [1, 1]} : vector<8x10xf32> to vector<8x8xf32>
    %39 = vector.extract_strided_slice %37 {offsets = [0, 8], sizes = [8, 1], strides = [1, 1]} : vector<8x10xf32> to vector<8x1xf32>
    %40 = vector.extract_strided_slice %37 {offsets = [0, 9], sizes = [8, 1], strides = [1, 1]} : vector<8x10xf32> to vector<8x1xf32>
    %41 = tpu.transpose %39, [1, 0] : vector<8x1xf32> -> vector<1x8xf32>
    %42 = vector.broadcast %40 : vector<8x1xf32> to vector<8x8xf32>
    %43 = vector.broadcast %41 : vector<1x8xf32> to vector<8x8xf32>
    %44 = arith.addf %42, %43 : vector<8x8xf32>
    %cst_15 = arith.constant 2.000000e-01 : f32
    %45 = vector.broadcast %cst_15 : f32 to vector<8x8xf32>
    %46 = arith.mulf %45, %44 : vector<8x8xf32>
    %47 = arith.maximumf %44, %46 : vector<8x8xf32>
    %48 = arith.addf %47, %5 : vector<8x8xf32>
    %cst_16 = arith.constant dense<0xFF800000> : vector<8xf32>
    %49 = vector.multi_reduction <maximumf>, %48, %cst_16 [1] : vector<8x8xf32> to vector<8xf32>
    %50 = vector.shape_cast %49 : vector<8xf32> to vector<8x1xf32>
    %51 = vector.broadcast %50 : vector<8x1xf32> to vector<8x8xf32>
    %52 = arith.subf %48, %51 : vector<8x8xf32>
    %53 = math.exp %52 : vector<8x8xf32>
    %54 = arith.mulf %53, %4 : vector<8x8xf32>
    %cst_17 = arith.constant dense<0.000000e+00> : vector<8xf32>
    %55 = vector.multi_reduction <add>, %54, %cst_17 [1] : vector<8x8xf32> to vector<8xf32>
    %56 = vector.shape_cast %55 : vector<8xf32> to vector<8x1xf32>
    %cst_18 = arith.constant 0.000000e+00 : f32
    %57 = vector.broadcast %cst_18 : f32 to vector<8x1xf32>
    %58 = arith.cmpf oeq, %56, %57 : vector<8x1xf32>
    %cst_19 = arith.constant 1.000000e+00 : f32
    %59 = vector.broadcast %cst_19 : f32 to vector<8x1xf32>
    %60 = arith.select %58, %59, %56 : vector<8x1xi1>, vector<8x1xf32>
    %61 = tpu.reciprocal %60 : vector<8x1xf32> -> vector<8x1xf32>
    %62 = vector.broadcast %61 : vector<8x1xf32> to vector<8x8xf32>
    %63 = arith.mulf %54, %62 : vector<8x8xf32>
    %cst_20 = arith.constant dense<0.000000e+00> : vector<8x8xf32>
    %64 = tpu.matmul %63, %38, %cst_20 {dimension_numbers = #tpu.dot_dimension_numbers<[1], [0], [0], [1], [0, 0, 1, 1], [], []>} : vector<8x8xf32>, vector<8x8xf32>, vector<8x8xf32> -> vector<8x8xf32>
    %65 = vector.broadcast %3 : vector<1x8xf32> to vector<8x8xf32>
    %66 = arith.addf %64, %65 : vector<8x8xf32>
    %cst_21 = arith.constant dense<0xFF800000> : vector<8xf32>
    %67 = vector.multi_reduction <maximumf>, %66, %cst_21 [1] : vector<8x8xf32> to vector<8xf32>
    %68 = vector.shape_cast %67 : vector<8xf32> to vector<8x1xf32>
    %69 = vector.broadcast %68 : vector<8x1xf32> to vector<8x8xf32>
    %70 = arith.subf %66, %69 : vector<8x8xf32>
    %71 = math.exp %70 : vector<8x8xf32>
    %cst_22 = arith.constant dense<0.000000e+00> : vector<8xf32>
    %72 = vector.multi_reduction <add>, %71, %cst_22 [1] : vector<8x8xf32> to vector<8xf32>
    %73 = vector.shape_cast %72 : vector<8xf32> to vector<8x1xf32>
    %74 = tpu.reciprocal %73 : vector<8x1xf32> -> vector<8x1xf32>
    %75 = vector.broadcast %74 : vector<8x1xf32> to vector<8x8xf32>
    %76 = arith.mulf %71, %75 : vector<8x8xf32>
    %c0_23 = arith.constant 0 : index
    %c0_24 = arith.constant 0 : index
    %77 = vector.load %arg2[%c0_23, %c0_24] : memref<8x8xf32, #tpu.memory_space<vmem>>, vector<8x8xf32>
    tpu.vector_store %arg2[%c0_23, %c0_24], %76 {strides = array<i32>} : memref<8x8xf32, #tpu.memory_space<vmem>>, vector<8x8xf32>,
    return
  }
}

</mosaic_0001>

<bundles_post_ra>
// kernel: tpu_custom_call.1
= control target key start
LH: loop header
LB: loop body
LE: loop exit
PB: predicated region body
PF: predicated region fallthrough
CT: control target
= control target key end

     0   :  { %vm22_vm0 = vcmask 64512   ;;  %v561_v2 = vmov 0.0   ;;  %vm562_vm1 = vmmov 0   ;;  %s630_s0 = inlined_call_operand.vmem [shape: f32[8,8], index: 0, kind: input, shape index: {}]   ;;  %s631_s1 = inlined_call_operand.vmem [shape: f32[58,34], index: 1, kind: input, shape index: {}]   ;;  %s632_s2 = inlined_call_operand.hbm [shape: f32[8,8], index: 2, kind: output, shape index: {}]  }
   0x1   :  { %v12_v0 = vld [vmem:[%s631_s1] sm:$0xff]  ;;  %491 = vmatprep.subr.mxu0 %v561_v2  ;;  %493 = vmatprep.mubr.msk.f32.mxu0 %vm562_vm1, %v561_v2 }
   0x2   :  { %v21_v1 = vld [vmem:[%s630_s0] sm:$0xff] }
   0x3   :  { %7 = vsyncpa [#allocation3], 0  ;;  %492 = vmatpush3.msra.mxu0 %v12_v0  ;;  %496 = vmatprep.subr.mxu1 %v561_v2  ;;  %v563_v3 = vmov 33   ;;  %s564_s0 = smov 96   ;;  %v136_v7 = vlaneseq  ;;  %v20_v15 = vld [vmem:[%s631_s1 + $0x32] sm:$0xff]  ;;  %v19_v22 = vld [vmem:[%s631_s1 + $0x2a] sm:$0xff] }
   0x4   :  { %494 = vmatmul.mubr.msk.f32.vlgmr.msra.gmra.mxu0 %vm22_vm0, %v21_v1  ;;  %498 = vmatprep.mubr.msk.f32.mxu1 %vm562_vm1, %v561_v2  ;;  %v17_v26 = vld [vmem:[%s631_s1 + $0x21] sm:$0xff]  ;;  %v16_v27 = vld [vmem:[%s631_s1 + $0x19] sm:$0xff]  ;;  %v15_v32 = vld [vmem:[%s631_s1 + $0x11] sm:$0xff]  ;;  %v565_v34 = vmov 9   ;;  %vm235_vm3 = vcmask 261120   ;;  %s566_s27 = smov 120  }
   0x5   :  { %501 = vmatprep.subr.mxu0 %v561_v2  ;;  %509 = vmatprep.mubr.msk.f32.mxu0 %vm562_vm1, %v561_v2  ;;  %v137_v8 = vshrl.u32 %v136_v7, 7  ;;  %v14_v33 = vld [vmem:[%s631_s1 + $0x9] sm:$0xff]  ;;  %v475_v35 = vld [vmem:[%s631_s1 + $0x8] ss:$0 sm:$0xff]  ;;  %s567_s30 = smov [#allocation2]  }
   0x6   :  { %524 = vset.pattern.permute.xlu0 %v563_v3  ;;  %502 = vmatpush3.msra.mxu0 %v17_v26  ;;  %v478_v60 = vld [vmem:[%s631_s1 + $0x29] ss:$0 sm:$0xff]  ;;  %s466_s3 = sshll.u32 %s567_s30, 4  ;;  %s467_s3 = int_to_ptr.vmem [resolvable:$true] %s466_s3 }
   0x7   :  { %v138_v9 = vsub.s32 0, %v137_v8  ;;  %503 = vmatprep.subr.mxu0 %v561_v2  ;;  %s539_s1 = scalar_lea.vmem %s467_s3, 128  ;;  %p544_p1 = scmp.lt.s32.totalorder %s467_s3, %s467_s3 }
   0x8   :  { %504 = vmatpush3.msra.mxu0 %v16_v27  ;;  %p540_p0 = scmp.ne.s32.totalorder %s467_s3, %s539_s1  ;;  %p545_p2 = scmp.lt.s32.totalorder %s539_s1, %s539_s1 }
   0x9   :  { %505 = vmatprep.subr.mxu0 %v561_v2 }
   0xa   :  { %506 = vmatpush3.msra.mxu0 %v15_v32  ;;  %p546_p3 = por %p545_p2, %p544_p1 }
   0xb   :  { %507 = vmatprep.subr.mxu0 %v561_v2 }
   0xc   :  { %508 = vmatpush3.msra.mxu0 %v14_v33  ;;  %p547_p4 = pnand %p546_p3, %p540_p0 }
  0xc4   :  { %v92_v4 = vpop.f32.mrf.mxu0 }
  0xc5   :  { %97 = vrot.lane.b32.xlu0 %v92_v4, %s564_s0  ;;  %497 = vmatpush3.msra.mxu1 %v92_v4 }
  0xc6   :  { %v495_v5 = vpop.f32.mrf.mxu0  ;;  %512 = vmatprep.subr.mxu1 %v561_v2 }
  0xc9   :  { %133 = vperm.xlu0 %524, %v92_v4  }
  0xcd   :  { %526 = vset.pattern.permute.xlu0 %v565_v34 }
 0x137   :  { %v98_v6 = vpop.permute.xlu0 %97 }
 0x138   :  { %100 = vxpose.xlu1.b32.start.end [1/1] (short) (narrow) %v98_v6, 8 }
 0x144   :  { %v134_v12 = vpop.permute.xlu0 %133 }
 0x156   :  { %525 = vset.pattern.permute.xlu1 %v565_v34 }
 0x1b4   :  { %v116_v10 = vpop.trf.xlu1 }
 0x1b5   :  { %v139_v11 = vrot.slane %v116_v10, %v138_v9 }
 0x1b7   :  { %v140_v13 = vadd.f32 %v139_v11, %v134_v12 }
 0x1b9   :  { %v141_v14 = vmul.f32 0.2, %v140_v13 }
 0x1bb   :  { %v142_v16 = vmax.f32 %v140_v13, %v141_v14 }
 0x1bd   :  { %v143_v17 = vadd.f32 %v142_v16, %v20_v15 }
 0x1bf   :  { %v144_v18 = vsel %vm22_vm0, %v143_v17, -inf }
 0x1c0   :  { %145 = vmax.xlane.f32.xlu1 %v144_v18 }
 0x249   :  { %v146_v19 = vpop.xlane.xlu1 %145 }
 0x24a   :  { %v147_v20 = vsub.f32 %v143_v17, %v146_v19 }
 0x24c   :  { %v148_v21 = vmul.f32 1.442695, %v147_v20 }
 0x24e   :  { %527 = vpow2.f32 %v148_v21 }
 0x25b   :  { %v528_v23 = vpop.eup %527 }
 0x25c   :  { %v150_v24 = vmul.f32 %v528_v23, %v19_v22 }
 0x25e   :  { %v151_v25 = vsel %vm22_vm0, %v150_v24, 0.0 }
 0x25f   :  { %152 = vadd.xlane.f32.xlu0 %v151_v25 }
 0x2e8   :  { %v153_v28 = vpop.xlane.xlu0 %152 }
 0x2e9   :  { %vm154_vm2 = vcmp.eq.f32.partialorder %v153_v28, 0.0 }
 0x2ea   :  { %v155_v29 = vsel %vm154_vm2, 1.0, %v153_v28 }
 0x2eb   :  { %529 = vrcp.f32 %v155_v29 }
 0x2f8   :  { %v530_v30 = vpop.eup %529 }
 0x2f9   :  { %v157_v31 = vmul.f32 %v530_v30, %v150_v24 }
 0x2fb   :  { %499 = vmatmul.mubr.msk.f32.vlgmr.msra.gmra.mxu1 %vm22_vm0, %v157_v31 }
 0x2fc   :  { %514 = vmatprep.mubr.msk.f32.mxu1 %vm562_vm1, %v561_v2 }
 0x3bb   :  { %v231_v36 = vpop.f32.mrf.mxu1 }
 0x3bc   :  { %v232_v37 = vadd.f32 %v475_v35, %v231_v36 }
 0x3bd   :  { %v500_v38 = vpop.f32.mrf.mxu1 }
 0x3be   :  { %510 = vmatmul.mubr.msk.f32.vlgmr.msra.gmra.mxu0 %vm235_vm3, %v232_v37 }
 0x47e   :  { %v305_v39 = vpop.f32.mrf.mxu0 }
 0x47f   :  { %346 = vperm.xlu1 %525, %v305_v39   ;;  %310 = vrot.lane.b32.xlu0 %v305_v39, %s566_s27 }
 0x480   :  { %513 = vmatpush3.msra.mxu1 %v305_v39  ;;  %v511_v40 = vpop.f32.mrf.mxu0 }
 0x4f1   :  { %v311_v41 = vpop.permute.xlu0 %310 }
 0x4f2   :  { %313 = vxpose.xlu1.b32.start.end [1/1] (short) (narrow) %v311_v41, 8 }
 0x4fa   :  { %v347_v42 = vpop.permute.xlu1 %346 }
 0x56e   :  { %v329_v43 = vpop.trf.xlu1 }
 0x56f   :  { %v352_v44 = vrot.slane %v329_v43, %v138_v9 }
 0x571   :  { %v353_v45 = vadd.f32 %v352_v44, %v347_v42 }
 0x573   :  { %v354_v46 = vmul.f32 0.2, %v353_v45 }
 0x575   :  { %v355_v47 = vmax.f32 %v353_v45, %v354_v46 }
 0x577   :  { %v356_v48 = vadd.f32 %v355_v47, %v20_v15 }
 0x579   :  { %v357_v49 = vsel %vm22_vm0, %v356_v48, -inf }
 0x57a   :  { %358 = vmax.xlane.f32.xlu0 %v357_v49 }
 0x603   :  { %v359_v50 = vpop.xlane.xlu0 %358 }
 0x604   :  { %v360_v51 = vsub.f32 %v356_v48, %v359_v50 }
 0x606   :  { %v361_v52 = vmul.f32 1.442695, %v360_v51 }
 0x608   :  { %531 = vpow2.f32 %v361_v52 }
 0x615   :  { %v532_v53 = vpop.eup %531 }
 0x616   :  { %v363_v54 = vmul.f32 %v532_v53, %v19_v22 }
 0x618   :  { %v364_v55 = vsel %vm22_vm0, %v363_v54, 0.0 }
 0x619   :  { %365 = vadd.xlane.f32.xlu0 %v364_v55 }
 0x6a2   :  { %v366_v56 = vpop.xlane.xlu0 %365 }
 0x6a3   :  { %vm367_vm4 = vcmp.eq.f32.partialorder %v366_v56, 0.0 }
 0x6a4   :  { %v368_v57 = vsel %vm367_vm4, 1.0, %v366_v56 }
 0x6a5   :  { %533 = vrcp.f32 %v368_v57 }
 0x6b2   :  { %v534_v58 = vpop.eup %533 }
 0x6b3   :  { %v370_v59 = vmul.f32 %v534_v58, %v363_v54 }
 0x6b5   :  { %515 = vmatmul.mubr.msk.f32.vlgmr.msra.gmra.mxu1 %vm22_vm0, %v370_v59 }
 0x775   :  { %v444_v61 = vpop.f32.mrf.mxu1 }
 0x776   :  { %v445_v62 = vadd.f32 %v478_v60, %v444_v61 }
 0x777   :  { %v516_v63 = vpop.f32.mrf.mxu1 }
 0x778   :  { %v448_v0 = vsel %vm22_vm0, %v445_v62, -inf }
 0x779   :  { %449 = vmax.xlane.f32.xlu0 %v448_v0 }
 0x802   :  { %v450_v1 = vpop.xlane.xlu0 %449 }
 0x803   :  { %v451_v2 = vsub.f32 %v445_v62, %v450_v1 }
 0x805   :  { %v452_v3 = vmul.f32 1.442695, %v451_v2 }
 0x807   :  { %535 = vpow2.f32 %v452_v3 }
 0x814   :  { %v536_v4 = vpop.eup %535 }
 0x815   :  { %v454_v5 = vsel %vm22_vm0, %v536_v4, 0.0 }
 0x816   :  { %455 = vadd.xlane.f32.xlu1 %v454_v5 }
 0x89f   :  { %v456_v6 = vpop.xlane.xlu1 %455 }
 0x8a0   :  { %537 = vrcp.f32 %v456_v6 }
 0x8ad   :  { %v538_v7 = vpop.eup %537 }
 0x8ae   :  { %v458_v8 = vmul.f32 %v538_v7, %v536_v4 }
 0x8b0   :  { %459 = vst.msk [vmem:[#allocation2] sm:$0xff] %vm22_vm0, %v458_v8 }
 0x8b1   :  { %550 = shalt.err (!%p547_p4)
}
 0x8b2   :  { %469 = dma.vmem_to_hbm [thread:$0]  %s467_s3, 128, %s632_s2, [#allocation3]  }
 0x8b3   :  { %559 = dma.done.wait [#allocation3], 128  }
 0x8b4   :  { %560 = vsyncadd [#allocation3], 4294967168 }
 0x8b5   :  { %473 = vsyncpa [#allocation3], 1 }

</bundles_post_ra>
